<compile_context>
chip_gen: v7x
topology: tpu7x:2x2x1
jax: 0.10.0
libtpu: 0.0.40
codegen_flags: <defaults>
</compile_context>

<pallas_src>
import jax
import jax.numpy as jnp
import numpy as np
from jax import lax
from jax.experimental import pallas as pl
from jax.experimental.pallas import tpu as pltpu

# ---------------- problem sizes (small, consistent with the module) ----------------
N_VOCAB = 50
EMBED = 32
HIDDEN = 32
BIO = 5
SEQ = 8
G4 = 4 * HIDDEN                # 128: LSTM gate width (also the lane-dense output width)
OUT_PAD = 128                  # padded output width (sliced back to BIO in the wrapper)
V_PAD = 128                    # vocab padded to a full lane width for the one-hot matmul
MAX_NORM = float(BIO)          # nn.Embedding max_norm (= BIOset_size in the buggy ctor)
PADDING_IDX = HIDDEN           # nn.Embedding padding_idx (= hidden_dim in the buggy ctor)

# Row layout of the packed parameter slab (each slice starts on an 8-sublane boundary).
R_WIH, R_WHH, R_WOUT, R_B, R_BOUT = 0, 32, 64, 96, 104
PARAM_ROWS = 112


# ---------------------------------- kernel ----------------------------------
def ner_kernel(ids_ref,      # VMEM (S, 1)   int32 token ids
               params_ref,   # VMEM (112, 128) packed parameters
               emb_ref,      # VMEM (V_PAD, E) padded embedding table
               out_ref):     # VMEM (S, 128)  padded log-softmax scores
    H = HIDDEN
    S = out_ref.shape[0]

    # ---- packed parameters (single DMA'd slab; static, 8-aligned row slices) -------
    wih_t  = params_ref[R_WIH:R_WIH + EMBED, :]     # (E, 4H)  g-cols pre-scaled by 2
    whh_t  = params_ref[R_WHH:R_WHH + H, :]         # (H, 4H)  g-cols pre-scaled by 2
    wout_t = params_ref[R_WOUT:R_WOUT + H, :]       # (H, 128) cols >= BIO are zero
    b      = params_ref[R_B:R_B + 1, :]             # (1, 4H)  g-lanes pre-scaled by 2
    bout   = params_ref[R_BOUT:R_BOUT + 1, :]       # (1, 128) lanes >= BIO are -1e30

    # ---- 1) embedding lookup as a one-hot MXU matmul (no dynamic addressing) -------
    ids_col = ids_ref[...]                                               # (S, 1) int32
    vocab_iota = lax.broadcasted_iota(jnp.int32, (S, V_PAD), 1)
    onehot = (vocab_iota == ids_col).astype(jnp.float32)                 # (S, V_PAD)
    x = jnp.dot(onehot, emb_ref[...], preferred_element_type=jnp.float32)  # (S, E)

    # ---- 2) max_norm renorm + hoisted input projection ------------------------------
    nrm = jnp.sqrt(jnp.sum(x * x, axis=-1, keepdims=True))               # (S, 1)
    x = x * jnp.where(nrm > MAX_NORM, MAX_NORM / (nrm + 1e-7), 1.0)
    xg = jnp.dot(x, wih_t, preferred_element_type=jnp.float32) + b       # (S, 4H)

    # ---- 3) LSTM recurrence (PyTorch gate order i,f,g,o), fully unrolled ------------
    # One sigmoid push per step; tanh on the g lanes via tanh(z) = 2*sigmoid(2z) - 1
    # (the 2x on z is folded into the g-gate weight/bias columns in the wrapper).
    lanes = lax.broadcasted_iota(jnp.int32, (1, 4 * H), 1)
    is_g = (lanes >= 2 * H) & (lanes < 3 * H)
    act_scale = jnp.where(is_g, 2.0, 1.0)            # hoisted per-lane constants
    act_shift = jnp.where(is_g, -1.0, 0.0)

    h = jnp.zeros((1, H), jnp.float32)
    c = jnp.zeros((1, H), jnp.float32)
    hs = []
    for t in range(S):                               # static unroll (S = 8)
        gates = xg[t:t + 1, :] + jnp.dot(h, whh_t,
                                         preferred_element_type=jnp.float32)   # (1, 4H)
        act = act_scale * jax.nn.sigmoid(gates) + act_shift                    # (1, 4H)
        i_g = act[:, 0 * H:1 * H]
        f_g = act[:, 1 * H:2 * H]
        g_g = act[:, 2 * H:3 * H]
        o_g = act[:, 3 * H:4 * H]
        c = f_g * c + i_g * g_g
        h = o_g * jnp.tanh(c)
        hs.append(h)                                 # hidden states stay in registers

    # ---- 4) batched output head + log_softmax on the lane-dense padded slab ---------
    hs_mat = jnp.concatenate(hs, axis=0)                                  # (S, H)
    logits = jnp.dot(hs_mat, wout_t, preferred_element_type=jnp.float32) + bout
    m = jnp.max(logits, axis=-1, keepdims=True)
    lse = jnp.log(jnp.sum(jnp.exp(logits - m), axis=-1, keepdims=True)) + m
    out_ref[...] = (logits - lse).astype(out_ref.dtype)


# ---------------------------------- wrapper ----------------------------------
def ner_tagger_forward(sentence, emb_table, w_ih, w_hh, b_ih, b_hh, w_out, b_out):
    """sentence: (S,) int32 token ids. Returns (S, BIO) float32 log-probabilities."""
    S = sentence.shape[0]

    # Fold the tanh<->sigmoid identity into the weights: scale g-gate columns by 2.
    col_scale = jnp.ones((G4,), jnp.float32).at[2 * HIDDEN:3 * HIDDEN].set(2.0)
    wih_t = jnp.asarray(w_ih, jnp.float32).T * col_scale                  # (E, 4H)
    whh_t = jnp.asarray(w_hh, jnp.float32).T * col_scale                  # (H, 4H)
    b = (jnp.asarray(b_ih, jnp.float32) + jnp.asarray(b_hh, jnp.float32)) * col_scale

    # Lane-dense padded output head: zero weight columns, -1e30 bias on padded lanes
    # so they contribute exp(...) = 0 to the softmax sum (f32 only).
    wout_t = jnp.zeros((HIDDEN, OUT_PAD), jnp.float32).at[:, :BIO].set(
        jnp.asarray(w_out, jnp.float32).T)
    bout = jnp.full((OUT_PAD,), -1e30, jnp.float32).at[:BIO].set(
        jnp.asarray(b_out, jnp.float32))

    # Pack all lane-128 parameters into one slab -> a single input DMA.
    params = jnp.zeros((PARAM_ROWS, G4), jnp.float32)
    params = params.at[R_WIH:R_WIH + EMBED, :].set(wih_t)
    params = params.at[R_WHH:R_WHH + HIDDEN, :].set(whh_t)
    params = params.at[R_WOUT:R_WOUT + HIDDEN, :].set(wout_t)
    params = params.at[R_B, :].set(b)
    params = params.at[R_BOUT, :].set(bout)

    # Vocab padded to 128 rows; rows >= N_VOCAB are zero (OOB ids -> zero embedding,
    # never an out-of-bounds VMEM read).
    emb_pad = jnp.zeros((V_PAD, EMBED), jnp.float32).at[:N_VOCAB, :].set(
        jnp.asarray(emb_table, jnp.float32))

    ids = sentence.astype(jnp.int32).reshape(S, 1)

    out_padded = pl.pallas_call(
        ner_kernel,
        out_shape=jax.ShapeDtypeStruct((S, OUT_PAD), jnp.float32),
        # No grid: single invocation, whole arrays resident in VMEM, no double-buffering.
        in_specs=[pl.BlockSpec(memory_space=pltpu.MemorySpace.VMEM),   # ids    (S, 1)
                  pl.BlockSpec(memory_space=pltpu.MemorySpace.VMEM),   # params (112, 128)
                  pl.BlockSpec(memory_space=pltpu.MemorySpace.VMEM)],  # emb    (128, 32)
        out_specs=pl.BlockSpec(memory_space=pltpu.MemorySpace.VMEM),
    )(ids, params, emb_pad)

    return out_padded[:, :BIO]


# ------------------------- pure-JAX reference (for checking) -------------------------
def ner_tagger_ref(sentence, emb_table, w_ih, w_hh, b_ih, b_hh, w_out, b_out):
    H = HIDDEN

    def lookup(i):
        v = emb_table[i]
        n = jnp.linalg.norm(v)
        return v * jnp.where(n > MAX_NORM, MAX_NORM / (n + 1e-7), 1.0)

    xs = jax.vmap(lookup)(sentence)

    def step(carry, x):
        h, c = carry
        gates = x @ w_ih.T + b_ih + h @ w_hh.T + b_hh
        i = jax.nn.sigmoid(gates[:H])
        f = jax.nn.sigmoid(gates[H:2 * H])
        g = jnp.tanh(gates[2 * H:3 * H])
        o = jax.nn.sigmoid(gates[3 * H:])
        c = f * c + i * g
        h = o * jnp.tanh(c)
        return (h, c), h

    (_, _), hs = lax.scan(step, (jnp.zeros(H), jnp.zeros(H)), xs)
    logits = hs @ w_out.T + b_out
    return jax.nn.log_softmax(logits, axis=1)


# ------------------------------------ main ------------------------------------
if __name__ == "__main__":
    key = jax.random.PRNGKey(0)
    k_emb, k_wih, k_whh, k_bih, k_bhh, k_wo, k_bo, k_ids = jax.random.split(key, 8)

    s_lstm = 1.0 / np.sqrt(HIDDEN)
    s_lin = 1.0 / np.sqrt(HIDDEN)

    emb_table = jax.random.normal(k_emb, (N_VOCAB, EMBED), jnp.float32)
    emb_table = emb_table.at[PADDING_IDX].set(0.0)      # padding_idx row is zeros
    w_ih = jax.random.uniform(k_wih, (4 * HIDDEN, EMBED), jnp.float32, -s_lstm, s_lstm)
    w_hh = jax.random.uniform(k_whh, (4 * HIDDEN, HIDDEN), jnp.float32, -s_lstm, s_lstm)
    b_ih = jax.random.uniform(k_bih, (4 * HIDDEN,), jnp.float32, -s_lstm, s_lstm)
    b_hh = jax.random.uniform(k_bhh, (4 * HIDDEN,), jnp.float32, -s_lstm, s_lstm)
    w_out = jax.random.uniform(k_wo, (BIO, HIDDEN), jnp.float32, -s_lin, s_lin)
    b_out = jax.random.uniform(k_bo, (BIO,), jnp.float32, -s_lin, s_lin)

    sentence = jax.random.randint(k_ids, (SEQ,), 0, N_VOCAB, jnp.int32)

    out = ner_tagger_forward(sentence, emb_table, w_ih, w_hh, b_ih, b_hh, w_out, b_out)
    out = jax.block_until_ready(out)

    ref = ner_tagger_ref(sentence, emb_table, w_ih, w_hh, b_ih, b_hh, w_out, b_out)
    # Tolerance has a small extra margin for the tanh(z) = 2*sigmoid(2z) - 1 rewrite
    # (mathematically exact; adds at most a few ulp per gate in f32).
    np.testing.assert_allclose(np.asarray(out), np.asarray(ref), atol=2e-5, rtol=2e-5)
    # log_softmax rows should (approximately) exponentiate-sum to 1
    assert np.allclose(np.exp(np.asarray(out)).sum(axis=1), 1.0, atol=1e-5)

    print("KERNEL_OK")
</pallas_src>

<mosaic_0001>
module attributes {stable_mosaic.version = 11 : i64} {
  func.func @ner_kernel(%arg0: memref<8x1xi32, #tpu.memory_space<vmem>>, %arg1: memref<112x128xf32, #tpu.memory_space<vmem>>, %arg2: memref<128x32xf32, #tpu.memory_space<vmem>>, %arg3: memref<8x128xf32, #tpu.memory_space<vmem>>) attributes {dimension_semantics = [], scalar_prefetch = 0 : i64, scratch_operands = 0 : i64, tpu.core_type = #tpu.core_type<tc>} {
    %c0 = arith.constant 0 : index
    %c0_0 = arith.constant 0 : index
    %0 = vector.load %arg1[%c0, %c0_0] : memref<112x128xf32, #tpu.memory_space<vmem>>, vector<32x128xf32>
    %c32 = arith.constant 32 : index
    %c0_1 = arith.constant 0 : index
    %1 = vector.load %arg1[%c32, %c0_1] : memref<112x128xf32, #tpu.memory_space<vmem>>, vector<32x128xf32>
    %c64 = arith.constant 64 : index
    %c0_2 = arith.constant 0 : index
    %2 = vector.load %arg1[%c64, %c0_2] : memref<112x128xf32, #tpu.memory_space<vmem>>, vector<32x128xf32>
    %c96 = arith.constant 96 : index
    %c0_3 = arith.constant 0 : index
    %3 = vector.load %arg1[%c96, %c0_3] : memref<112x128xf32, #tpu.memory_space<vmem>>, vector<1x128xf32>
    %c104 = arith.constant 104 : index
    %c0_4 = arith.constant 0 : index
    %4 = vector.load %arg1[%c104, %c0_4] : memref<112x128xf32, #tpu.memory_space<vmem>>, vector<1x128xf32>
    %c0_5 = arith.constant 0 : index
    %c0_6 = arith.constant 0 : index
    %5 = vector.load %arg0[%c0_5, %c0_6] : memref<8x1xi32, #tpu.memory_space<vmem>>, vector<8x1xi32>
    %6 = tpu.iota {dimensions = array<i32: 1>} : vector<8x128xi32>
    %7 = vector.broadcast %5 : vector<8x1xi32> to vector<8x128xi32>
    %8 = arith.cmpi eq, %6, %7 : vector<8x128xi32>
    %9 = arith.extui %8 : vector<8x128xi1> to vector<8x128xi32>
    %10 = arith.sitofp %9 : vector<8x128xi32> to vector<8x128xf32>
    %c0_7 = arith.constant 0 : index
    %c0_8 = arith.constant 0 : index
    %11 = vector.load %arg2[%c0_7, %c0_8] : memref<128x32xf32, #tpu.memory_space<vmem>>, vector<128x32xf32>
    %cst = arith.constant dense<0.000000e+00> : vector<8x32xf32>
    %12 = tpu.matmul %10, %11, %cst {dimension_numbers = #tpu.dot_dimension_numbers<[1], [0], [0], [1], [0, 0, 1, 1], [], []>} : vector<8x128xf32>, vector<128x32xf32>, vector<8x32xf32> -> vector<8x32xf32>
    %13 = arith.mulf %12, %12 : vector<8x32xf32>
    %cst_9 = arith.constant dense<0.000000e+00> : vector<8xf32>
    %14 = vector.multi_reduction <add>, %13, %cst_9 [1] : vector<8x32xf32> to vector<8xf32>
    %15 = vector.shape_cast %14 : vector<8xf32> to vector<8x1xf32>
    %16 = math.sqrt %15 : vector<8x1xf32>
    %cst_10 = arith.constant 5.000000e+00 : f32
    %17 = vector.broadcast %cst_10 : f32 to vector<8x1xf32>
    %18 = arith.cmpf ogt, %16, %17 : vector<8x1xf32>
    %cst_11 = arith.constant 1.000000e-07 : f32
    %19 = vector.broadcast %cst_11 : f32 to vector<8x1xf32>
    %20 = arith.addf %16, %19 : vector<8x1xf32>
    %cst_12 = arith.constant 5.000000e+00 : f32
    %21 = vector.broadcast %cst_12 : f32 to vector<8x1xf32>
    %22 = arith.divf %21, %20 : vector<8x1xf32>
    %cst_13 = arith.constant 1.000000e+00 : f32
    %23 = vector.broadcast %cst_13 : f32 to vector<8x1xf32>
    %24 = arith.select %18, %22, %23 : vector<8x1xi1>, vector<8x1xf32>
    %25 = vector.broadcast %24 : vector<8x1xf32> to vector<8x32xf32>
    %26 = arith.mulf %12, %25 : vector<8x32xf32>
    %cst_14 = arith.constant dense<0.000000e+00> : vector<8x128xf32>
    %27 = tpu.matmul %26, %0, %cst_14 {dimension_numbers = #tpu.dot_dimension_numbers<[1], [0], [0], [1], [0, 0, 1, 1], [], []>} : vector<8x32xf32>, vector<32x128xf32>, vector<8x128xf32> -> vector<8x128xf32>
    %28 = vector.broadcast %3 : vector<1x128xf32> to vector<8x128xf32>
    %29 = arith.addf %27, %28 : vector<8x128xf32>
    %30 = tpu.iota {dimensions = array<i32: 1>} : vector<1x128xi32>
    %c64_i32 = arith.constant 64 : i32
    %31 = vector.broadcast %c64_i32 : i32 to vector<1x128xi32>
    %32 = arith.cmpi sge, %30, %31 : vector<1x128xi32>
    %c96_i32 = arith.constant 96 : i32
    %33 = vector.broadcast %c96_i32 : i32 to vector<1x128xi32>
    %34 = arith.cmpi slt, %30, %33 : vector<1x128xi32>
    %35 = arith.andi %32, %34 : vector<1x128xi1>
    %cst_15 = arith.constant 2.000000e+00 : f32
    %cst_16 = arith.constant 1.000000e+00 : f32
    %36 = vector.broadcast %cst_15 : f32 to vector<1x128xf32>
    %37 = vector.broadcast %cst_16 : f32 to vector<1x128xf32>
    %38 = arith.select %35, %36, %37 : vector<1x128xi1>, vector<1x128xf32>
    %cst_17 = arith.constant -1.000000e+00 : f32
    %cst_18 = arith.constant 0.000000e+00 : f32
    %39 = vector.broadcast %cst_17 : f32 to vector<1x128xf32>
    %40 = vector.broadcast %cst_18 : f32 to vector<1x128xf32>
    %41 = arith.select %35, %39, %40 : vector<1x128xi1>, vector<1x128xf32>
    %cst_19 = arith.constant 0.000000e+00 : f32
    %42 = vector.broadcast %cst_19 : f32 to vector<1x32xf32>
    %cst_20 = arith.constant 0.000000e+00 : f32
    %43 = vector.broadcast %cst_20 : f32 to vector<1x32xf32>
    %44 = vector.extract_strided_slice %29 {offsets = [0, 0], sizes = [1, 128], strides = [1, 1]} : vector<8x128xf32> to vector<1x128xf32>
    %cst_21 = arith.constant dense<0.000000e+00> : vector<1x128xf32>
    %45 = tpu.matmul %42, %1, %cst_21 {dimension_numbers = #tpu.dot_dimension_numbers<[1], [0], [0], [1], [0, 0, 1, 1], [], []>} : vector<1x32xf32>, vector<32x128xf32>, vector<1x128xf32> -> vector<1x128xf32>
    %46 = arith.addf %44, %45 : vector<1x128xf32>
    %47 = arith.negf %46 : vector<1x128xf32>
    %48 = math.exp %47 : vector<1x128xf32>
    %cst_22 = arith.constant 1.000000e+00 : f32
    %49 = vector.broadcast %cst_22 : f32 to vector<1x128xf32>
    %50 = arith.addf %49, %48 : vector<1x128xf32>
    %51 = arith.divf %49, %50 : vector<1x128xf32>
    %52 = arith.mulf %38, %51 : vector<1x128xf32>
    %53 = arith.addf %52, %41 : vector<1x128xf32>
    %54 = vector.extract_strided_slice %53 {offsets = [0, 0], sizes = [1, 32], strides = [1, 1]} : vector<1x128xf32> to vector<1x32xf32>
    %55 = vector.extract_strided_slice %53 {offsets = [0, 32], sizes = [1, 32], strides = [1, 1]} : vector<1x128xf32> to vector<1x32xf32>
    %56 = vector.extract_strided_slice %53 {offsets = [0, 64], sizes = [1, 32], strides = [1, 1]} : vector<1x128xf32> to vector<1x32xf32>
    %57 = vector.extract_strided_slice %53 {offsets = [0, 96], sizes = [1, 32], strides = [1, 1]} : vector<1x128xf32> to vector<1x32xf32>
    %58 = arith.mulf %55, %43 : vector<1x32xf32>
    %59 = arith.mulf %54, %56 : vector<1x32xf32>
    %60 = arith.addf %58, %59 : vector<1x32xf32>
    %61 = math.tanh %60 : vector<1x32xf32>
    %62 = arith.mulf %57, %61 : vector<1x32xf32>
    %63 = vector.extract_strided_slice %29 {offsets = [1, 0], sizes = [1, 128], strides = [1, 1]} : vector<8x128xf32> to vector<1x128xf32>
    %cst_23 = arith.constant dense<0.000000e+00> : vector<1x128xf32>
    %64 = tpu.matmul %62, %1, %cst_23 {dimension_numbers = #tpu.dot_dimension_numbers<[1], [0], [0], [1], [0, 0, 1, 1], [], []>} : vector<1x32xf32>, vector<32x128xf32>, vector<1x128xf32> -> vector<1x128xf32>
    %65 = arith.addf %63, %64 : vector<1x128xf32>
    %66 = arith.negf %65 : vector<1x128xf32>
    %67 = math.exp %66 : vector<1x128xf32>
    %cst_24 = arith.constant 1.000000e+00 : f32
    %68 = vector.broadcast %cst_24 : f32 to vector<1x128xf32>
    %69 = arith.addf %68, %67 : vector<1x128xf32>
    %70 = arith.divf %68, %69 : vector<1x128xf32>
    %71 = arith.mulf %38, %70 : vector<1x128xf32>
    %72 = arith.addf %71, %41 : vector<1x128xf32>
    %73 = vector.extract_strided_slice %72 {offsets = [0, 0], sizes = [1, 32], strides = [1, 1]} : vector<1x128xf32> to vector<1x32xf32>
    %74 = vector.extract_strided_slice %72 {offsets = [0, 32], sizes = [1, 32], strides = [1, 1]} : vector<1x128xf32> to vector<1x32xf32>
    %75 = vector.extract_strided_slice %72 {offsets = [0, 64], sizes = [1, 32], strides = [1, 1]} : vector<1x128xf32> to vector<1x32xf32>
    %76 = vector.extract_strided_slice %72 {offsets = [0, 96], sizes = [1, 32], strides = [1, 1]} : vector<1x128xf32> to vector<1x32xf32>
    %77 = arith.mulf %74, %60 : vector<1x32xf32>
    %78 = arith.mulf %73, %75 : vector<1x32xf32>
    %79 = arith.addf %77, %78 : vector<1x32xf32>
    %80 = math.tanh %79 : vector<1x32xf32>
    %81 = arith.mulf %76, %80 : vector<1x32xf32>
    %82 = vector.extract_strided_slice %29 {offsets = [2, 0], sizes = [1, 128], strides = [1, 1]} : vector<8x128xf32> to vector<1x128xf32>
    %cst_25 = arith.constant dense<0.000000e+00> : vector<1x128xf32>
    %83 = tpu.matmul %81, %1, %cst_25 {dimension_numbers = #tpu.dot_dimension_numbers<[1], [0], [0], [1], [0, 0, 1, 1], [], []>} : vector<1x32xf32>, vector<32x128xf32>, vector<1x128xf32> -> vector<1x128xf32>
    %84 = arith.addf %82, %83 : vector<1x128xf32>
    %85 = arith.negf %84 : vector<1x128xf32>
    %86 = math.exp %85 : vector<1x128xf32>
    %cst_26 = arith.constant 1.000000e+00 : f32
    %87 = vector.broadcast %cst_26 : f32 to vector<1x128xf32>
    %88 = arith.addf %87, %86 : vector<1x128xf32>
    %89 = arith.divf %87, %88 : vector<1x128xf32>
    %90 = arith.mulf %38, %89 : vector<1x128xf32>
    %91 = arith.addf %90, %41 : vector<1x128xf32>
    %92 = vector.extract_strided_slice %91 {offsets = [0, 0], sizes = [1, 32], strides = [1, 1]} : vector<1x128xf32> to vector<1x32xf32>
    %93 = vector.extract_strided_slice %91 {offsets = [0, 32], sizes = [1, 32], strides = [1, 1]} : vector<1x128xf32> to vector<1x32xf32>
    %94 = vector.extract_strided_slice %91 {offsets = [0, 64], sizes = [1, 32], strides = [1, 1]} : vector<1x128xf32> to vector<1x32xf32>
    %95 = vector.extract_strided_slice %91 {offsets = [0, 96], sizes = [1, 32], strides = [1, 1]} : vector<1x128xf32> to vector<1x32xf32>
    %96 = arith.mulf %93, %79 : vector<1x32xf32>
    %97 = arith.mulf %92, %94 : vector<1x32xf32>
    %98 = arith.addf %96, %97 : vector<1x32xf32>
    %99 = math.tanh %98 : vector<1x32xf32>
    %100 = arith.mulf %95, %99 : vector<1x32xf32>
    %101 = vector.extract_strided_slice %29 {offsets = [3, 0], sizes = [1, 128], strides = [1, 1]} : vector<8x128xf32> to vector<1x128xf32>
    %cst_27 = arith.constant dense<0.000000e+00> : vector<1x128xf32>
    %102 = tpu.matmul %100, %1, %cst_27 {dimension_numbers = #tpu.dot_dimension_numbers<[1], [0], [0], [1], [0, 0, 1, 1], [], []>} : vector<1x32xf32>, vector<32x128xf32>, vector<1x128xf32> -> vector<1x128xf32>
    %103 = arith.addf %101, %102 : vector<1x128xf32>
    %104 = arith.negf %103 : vector<1x128xf32>
    %105 = math.exp %104 : vector<1x128xf32>
    %cst_28 = arith.constant 1.000000e+00 : f32
    %106 = vector.broadcast %cst_28 : f32 to vector<1x128xf32>
    %107 = arith.addf %106, %105 : vector<1x128xf32>
    %108 = arith.divf %106, %107 : vector<1x128xf32>
    %109 = arith.mulf %38, %108 : vector<1x128xf32>
    %110 = arith.addf %109, %41 : vector<1x128xf32>
    %111 = vector.extract_strided_slice %110 {offsets = [0, 0], sizes = [1, 32], strides = [1, 1]} : vector<1x128xf32> to vector<1x32xf32>
    %112 = vector.extract_strided_slice %110 {offsets = [0, 32], sizes = [1, 32], strides = [1, 1]} : vector<1x128xf32> to vector<1x32xf32>
    %113 = vector.extract_strided_slice %110 {offsets = [0, 64], sizes = [1, 32], strides = [1, 1]} : vector<1x128xf32> to vector<1x32xf32>
    %114 = vector.extract_strided_slice %110 {offsets = [0, 96], sizes = [1, 32], strides = [1, 1]} : vector<1x128xf32> to vector<1x32xf32>
    %115 = arith.mulf %112, %98 : vector<1x32xf32>
    %116 = arith.mulf %111, %113 : vector<1x32xf32>
    %117 = arith.addf %115, %116 : vector<1x32xf32>
    %118 = math.tanh %117 : vector<1x32xf32>
    %119 = arith.mulf %114, %118 : vector<1x32xf32>
    %120 = vector.extract_strided_slice %29 {offsets = [4, 0], sizes = [1, 128], strides = [1, 1]} : vector<8x128xf32> to vector<1x128xf32>
    %cst_29 = arith.constant dense<0.000000e+00> : vector<1x128xf32>
    %121 = tpu.matmul %119, %1, %cst_29 {dimension_numbers = #tpu.dot_dimension_numbers<[1], [0], [0], [1], [0, 0, 1, 1], [], []>} : vector<1x32xf32>, vector<32x128xf32>, vector<1x128xf32> -> vector<1x128xf32>
    %122 = arith.addf %120, %121 : vector<1x128xf32>
    %123 = arith.negf %122 : vector<1x128xf32>
    %124 = math.exp %123 : vector<1x128xf32>
    %cst_30 = arith.constant 1.000000e+00 : f32
    %125 = vector.broadcast %cst_30 : f32 to vector<1x128xf32>
    %126 = arith.addf %125, %124 : vector<1x128xf32>
    %127 = arith.divf %125, %126 : vector<1x128xf32>
    %128 = arith.mulf %38, %127 : vector<1x128xf32>
    %129 = arith.addf %128, %41 : vector<1x128xf32>
    %130 = vector.extract_strided_slice %129 {offsets = [0, 0], sizes = [1, 32], strides = [1, 1]} : vector<1x128xf32> to vector<1x32xf32>
    %131 = vector.extract_strided_slice %129 {offsets = [0, 32], sizes = [1, 32], strides = [1, 1]} : vector<1x128xf32> to vector<1x32xf32>
    %132 = vector.extract_strided_slice %129 {offsets = [0, 64], sizes = [1, 32], strides = [1, 1]} : vector<1x128xf32> to vector<1x32xf32>
    %133 = vector.extract_strided_slice %129 {offsets = [0, 96], sizes = [1, 32], strides = [1, 1]} : vector<1x128xf32> to vector<1x32xf32>
    %134 = arith.mulf %131, %117 : vector<1x32xf32>
    %135 = arith.mulf %130, %132 : vector<1x32xf32>
    %136 = arith.addf %134, %135 : vector<1x32xf32>
    %137 = math.tanh %136 : vector<1x32xf32>
    %138 = arith.mulf %133, %137 : vector<1x32xf32>
    %139 = vector.extract_strided_slice %29 {offsets = [5, 0], sizes = [1, 128], strides = [1, 1]} : vector<8x128xf32> to vector<1x128xf32>
    %cst_31 = arith.constant dense<0.000000e+00> : vector<1x128xf32>
    %140 = tpu.matmul %138, %1, %cst_31 {dimension_numbers = #tpu.dot_dimension_numbers<[1], [0], [0], [1], [0, 0, 1, 1], [], []>} : vector<1x32xf32>, vector<32x128xf32>, vector<1x128xf32> -> vector<1x128xf32>
    %141 = arith.addf %139, %140 : vector<1x128xf32>
    %142 = arith.negf %141 : vector<1x128xf32>
    %143 = math.exp %142 : vector<1x128xf32>
    %cst_32 = arith.constant 1.000000e+00 : f32
    %144 = vector.broadcast %cst_32 : f32 to vector<1x128xf32>
    %145 = arith.addf %144, %143 : vector<1x128xf32>
    %146 = arith.divf %144, %145 : vector<1x128xf32>
    %147 = arith.mulf %38, %146 : vector<1x128xf32>
    %148 = arith.addf %147, %41 : vector<1x128xf32>
    %149 = vector.extract_strided_slice %148 {offsets = [0, 0], sizes = [1, 32], strides = [1, 1]} : vector<1x128xf32> to vector<1x32xf32>
    %150 = vector.extract_strided_slice %148 {offsets = [0, 32], sizes = [1, 32], strides = [1, 1]} : vector<1x128xf32> to vector<1x32xf32>
    %151 = vector.extract_strided_slice %148 {offsets = [0, 64], sizes = [1, 32], strides = [1, 1]} : vector<1x128xf32> to vector<1x32xf32>
    %152 = vector.extract_strided_slice %148 {offsets = [0, 96], sizes = [1, 32], strides = [1, 1]} : vector<1x128xf32> to vector<1x32xf32>
    %153 = arith.mulf %150, %136 : vector<1x32xf32>
    %154 = arith.mulf %149, %151 : vector<1x32xf32>
    %155 = arith.addf %153, %154 : vector<1x32xf32>
    %156 = math.tanh %155 : vector<1x32xf32>
    %157 = arith.mulf %152, %156 : vector<1x32xf32>
    %158 = vector.extract_strided_slice %29 {offsets = [6, 0], sizes = [1, 128], strides = [1, 1]} : vector<8x128xf32> to vector<1x128xf32>
    %cst_33 = arith.constant dense<0.000000e+00> : vector<1x128xf32>
    %159 = tpu.matmul %157, %1, %cst_33 {dimension_numbers = #tpu.dot_dimension_numbers<[1], [0], [0], [1], [0, 0, 1, 1], [], []>} : vector<1x32xf32>, vector<32x128xf32>, vector<1x128xf32> -> vector<1x128xf32>
    %160 = arith.addf %158, %159 : vector<1x128xf32>
    %161 = arith.negf %160 : vector<1x128xf32>
    %162 = math.exp %161 : vector<1x128xf32>
    %cst_34 = arith.constant 1.000000e+00 : f32
    %163 = vector.broadcast %cst_34 : f32 to vector<1x128xf32>
    %164 = arith.addf %163, %162 : vector<1x128xf32>
    %165 = arith.divf %163, %164 : vector<1x128xf32>
    %166 = arith.mulf %38, %165 : vector<1x128xf32>
    %167 = arith.addf %166, %41 : vector<1x128xf32>
    %168 = vector.extract_strided_slice %167 {offsets = [0, 0], sizes = [1, 32], strides = [1, 1]} : vector<1x128xf32> to vector<1x32xf32>
    %169 = vector.extract_strided_slice %167 {offsets = [0, 32], sizes = [1, 32], strides = [1, 1]} : vector<1x128xf32> to vector<1x32xf32>
    %170 = vector.extract_strided_slice %167 {offsets = [0, 64], sizes = [1, 32], strides = [1, 1]} : vector<1x128xf32> to vector<1x32xf32>
    %171 = vector.extract_strided_slice %167 {offsets = [0, 96], sizes = [1, 32], strides = [1, 1]} : vector<1x128xf32> to vector<1x32xf32>
    %172 = arith.mulf %169, %155 : vector<1x32xf32>
    %173 = arith.mulf %168, %170 : vector<1x32xf32>
    %174 = arith.addf %172, %173 : vector<1x32xf32>
    %175 = math.tanh %174 : vector<1x32xf32>
    %176 = arith.mulf %171, %175 : vector<1x32xf32>
    %177 = vector.extract_strided_slice %29 {offsets = [7, 0], sizes = [1, 128], strides = [1, 1]} : vector<8x128xf32> to vector<1x128xf32>
    %cst_35 = arith.constant dense<0.000000e+00> : vector<1x128xf32>
    %178 = tpu.matmul %176, %1, %cst_35 {dimension_numbers = #tpu.dot_dimension_numbers<[1], [0], [0], [1], [0, 0, 1, 1], [], []>} : vector<1x32xf32>, vector<32x128xf32>, vector<1x128xf32> -> vector<1x128xf32>
    %179 = arith.addf %177, %178 : vector<1x128xf32>
    %180 = arith.negf %179 : vector<1x128xf32>
    %181 = math.exp %180 : vector<1x128xf32>
    %cst_36 = arith.constant 1.000000e+00 : f32
    %182 = vector.broadcast %cst_36 : f32 to vector<1x128xf32>
    %183 = arith.addf %182, %181 : vector<1x128xf32>
    %184 = arith.divf %182, %183 : vector<1x128xf32>
    %185 = arith.mulf %38, %184 : vector<1x128xf32>
    %186 = arith.addf %185, %41 : vector<1x128xf32>
    %187 = vector.extract_strided_slice %186 {offsets = [0, 0], sizes = [1, 32], strides = [1, 1]} : vector<1x128xf32> to vector<1x32xf32>
    %188 = vector.extract_strided_slice %186 {offsets = [0, 32], sizes = [1, 32], strides = [1, 1]} : vector<1x128xf32> to vector<1x32xf32>
    %189 = vector.extract_strided_slice %186 {offsets = [0, 64], sizes = [1, 32], strides = [1, 1]} : vector<1x128xf32> to vector<1x32xf32>
    %190 = vector.extract_strided_slice %186 {offsets = [0, 96], sizes = [1, 32], strides = [1, 1]} : vector<1x128xf32> to vector<1x32xf32>
    %191 = arith.mulf %188, %174 : vector<1x32xf32>
    %192 = arith.mulf %187, %189 : vector<1x32xf32>
    %193 = arith.addf %191, %192 : vector<1x32xf32>
    %194 = math.tanh %193 : vector<1x32xf32>
    %195 = arith.mulf %190, %194 : vector<1x32xf32>
    %196 = tpu.concatenate %62, %81, %100, %119, %138, %157, %176, %195 in 0 : vector<1x32xf32>, vector<1x32xf32>, vector<1x32xf32>, vector<1x32xf32>, vector<1x32xf32>, vector<1x32xf32>, vector<1x32xf32>, vector<1x32xf32> -> vector<8x32xf32>
    %cst_37 = arith.constant dense<0.000000e+00> : vector<8x128xf32>
    %197 = tpu.matmul %196, %2, %cst_37 {dimension_numbers = #tpu.dot_dimension_numbers<[1], [0], [0], [1], [0, 0, 1, 1], [], []>} : vector<8x32xf32>, vector<32x128xf32>, vector<8x128xf32> -> vector<8x128xf32>
    %198 = vector.broadcast %4 : vector<1x128xf32> to vector<8x128xf32>
    %199 = arith.addf %197, %198 : vector<8x128xf32>
    %cst_38 = arith.constant dense<0xFF800000> : vector<8xf32>
    %200 = vector.multi_reduction <maximumf>, %199, %cst_38 [1] : vector<8x128xf32> to vector<8xf32>
    %201 = vector.shape_cast %200 : vector<8xf32> to vector<8x1xf32>
    %202 = vector.broadcast %201 : vector<8x1xf32> to vector<8x128xf32>
    %203 = arith.subf %199, %202 : vector<8x128xf32>
    %204 = math.exp %203 : vector<8x128xf32>
    %cst_39 = arith.constant dense<0.000000e+00> : vector<8xf32>
    %205 = vector.multi_reduction <add>, %204, %cst_39 [1] : vector<8x128xf32> to vector<8xf32>
    %206 = vector.shape_cast %205 : vector<8xf32> to vector<8x1xf32>
    %207 = math.log %206 : vector<8x1xf32>
    %208 = arith.addf %207, %201 : vector<8x1xf32>
    %209 = vector.broadcast %208 : vector<8x1xf32> to vector<8x128xf32>
    %210 = arith.subf %199, %209 : vector<8x128xf32>
    %c0_40 = arith.constant 0 : index
    %c0_41 = arith.constant 0 : index
    %211 = vector.load %arg3[%c0_40, %c0_41] : memref<8x128xf32, #tpu.memory_space<vmem>>, vector<8x128xf32>
    tpu.vector_store %arg3[%c0_40, %c0_41], %210 {strides = array<i32>} : memref<8x128xf32, #tpu.memory_space<vmem>>, vector<8x128xf32>,
    return
  }
}

</mosaic_0001>

<bundles_post_ra>
// kernel: tpu_custom_call.1
= control target key start
LH: loop header
LB: loop body
LE: loop exit
PB: predicated region body
PF: predicated region fallthrough
CT: control target
= control target key end

     0   :  { %v1603_v3 = vmov 0   ;;  %v1604_v4 = vmov 0.0|0.0   ;;  %vm1605_vm0 = vmmov 0   ;;  %v1606_v8 = vmov 0.0   ;;  %s1891_s0 = inlined_call_operand.vmem [shape: s32[8,1], index: 0, kind: input, shape index: {}]   ;;  %s1892_s1 = inlined_call_operand.vmem [shape: f32[112,128], index: 1, kind: input, shape index: {}]   ;;  %s1893_s2 = inlined_call_operand.vmem [shape: f32[128,32], index: 2, kind: input, shape index: {}]   ;;  %s1894_s3 = inlined_call_operand.hbm [shape: f32[8,128], index: 3, kind: output, shape index: {}]  }
   0x1   :  { %v29_v0 = vld [vmem:[%s1891_s0] sm:$0xff]  ;;  %v39_v2 = vld [vmem:[%s1893_s2 + $0x8] sm:$0xff]  ;;  %1522 = vset.pattern.permute.xlu0 %v1603_v3  ;;  %1430 = vmatprep.subr.bf16.mxu0 %v1604_v4  ;;  %v40_v6 = vld [vmem:[%s1893_s2 + $0x10] sm:$0xff] }
   0x2   :  { %v38_v1 = vld [vmem:[%s1893_s2] sm:$0xff]  ;;  %v41_v7 = vld [vmem:[%s1893_s2 + $0x18] sm:$0xff]  ;;  %33 = vperm.xlu0 %1522, %v29_v0   ;;  %1317 = vmatprep.mubr.msk.f32.mxu0 %vm1605_vm0, %v1606_v8  ;;  %v43_v11 = vld [vmem:[%s1893_s2 + $0x28] sm:$0xff] }
   0x3   :  { %v1431_v5 = vpack.c.bf16 %v39_v2, %v38_v1  ;;  %v1434_v9 = vpack.c.bf16 %v41_v7, %v40_v6  ;;  %1454 = vmatprep.subr.bf16.mxu1 %v1604_v4  ;;  %v42_v10 = vld [vmem:[%s1893_s2 + $0x20] sm:$0xff]  ;;  %1328 = vmatprep.mubr.msk.f32.mxu1 %vm1605_vm0, %v1606_v8 }
   0x5   :  { %1432 = vmatpush3.bf16.msra.mxu0 %v1431_v5 }
   0x6   :  { %1433 = vmatprep.subr.bf16.mxu0 %v1604_v4 }
   0x7   :  { %8 = vsyncpa [#allocation3], 0  ;;  %v1437_v12 = vpack.c.bf16 %v43_v11, %v42_v10  ;;  %v44_v13 = vld [vmem:[%s1893_s2 + $0x30] sm:$0xff]  ;;  %v45_v14 = vld [vmem:[%s1893_s2 + $0x38] sm:$0xff]  ;;  %v30_v28 = vlaneseq  ;;  %v1607_v31 = vmov 1.0   ;;  %vm125_vm2 = vcmask 261120  }
   0x8   :  { %v1440_v15 = vpack.c.bf16 %v45_v14, %v44_v13  ;;  %v46_v16 = vld [vmem:[%s1893_s2 + $0x40] sm:$0xff]  ;;  %v47_v17 = vld [vmem:[%s1893_s2 + $0x48] sm:$0xff]  ;;  %v48_v19 = vld [vmem:[%s1893_s2 + $0x50] sm:$0xff]  ;;  %s1608_s7 = smov 64   ;;  %s1609_s8 = smov 32   ;;  %vm1078_vm9 = vcmask 1040384  }
   0x9   :  { %1435 = vmatpush3.bf16.msra.mxu0 %v1434_v9  ;;  %v1443_v18 = vpack.c.bf16 %v47_v17, %v46_v16  ;;  %v49_v20 = vld [vmem:[%s1893_s2 + $0x58] sm:$0xff]  ;;  %v50_v22 = vld [vmem:[%s1893_s2 + $0x60] sm:$0xff]  ;;  %v51_v23 = vld [vmem:[%s1893_s2 + $0x68] sm:$0xff]  ;;  %v1696_v29 = vand.u32 127, %v30_v28  ;;  %vm1080_vm10 = vcmask 1041408   ;;  %vm1082_vm11 = vcmask 1042432  }
   0xa   :  { %1436 = vmatprep.subr.bf16.mxu0 %v1604_v4  ;;  %v1446_v21 = vpack.c.bf16 %v49_v20, %v48_v19  ;;  %v1449_v24 = vpack.c.bf16 %v51_v23, %v50_v22  ;;  %v52_v25 = vld [vmem:[%s1893_s2 + $0x70] sm:$0xff]  ;;  %v53_v26 = vld [vmem:[%s1893_s2 + $0x78] sm:$0xff]  ;;  %v15_v36 = vld [vmem:[%s1892_s1] sm:$0xff]  ;;  %vm1084_vm12 = vcmask 1043456   ;;  %vm1086_vm13 = vcmask 1044480   ;;  %s1610_s18 = smov [#allocation2]  }
   0xb   :  { %v1452_v27 = vpack.c.bf16 %v53_v26, %v52_v25  ;;  %v16_v37 = vld [vmem:[%s1892_s1 + $0x8] sm:$0xff]  ;;  %v17_v38 = vld [vmem:[%s1892_s1 + $0x10] sm:$0xff]  ;;  %v18_v40 = vld [vmem:[%s1892_s1 + $0x18] sm:$0xff]  ;;  %vm219_vm6 = vcmp.ge.s32.totalorder %v1696_v29, 64  ;;  %vm220_vm7 = vcmp.lt.s32.totalorder %v1696_v29, 96  ;;  %vm1088_vm14 = vcmask 1045504  }
   0xc   :  { %v1455_v39 = vpack.c.bf16 %v16_v37, %v15_v36  ;;  %v1458_v41 = vpack.c.bf16 %v18_v40, %v17_v38  ;;  %v19_v42 = vld [vmem:[%s1892_s1 + $0x20] sm:$0xff]  ;;  %v20_v43 = vld [vmem:[%s1892_s1 + $0x28] sm:$0xff]  ;;  %v21_v45 = vld [vmem:[%s1892_s1 + $0x30] sm:$0xff]  ;;  %vm1090_vm15 = vcmask 1046528   ;;  %s1189_s19 = sshll.u32 %s1610_s18, 4  ;;  %s1190_s19 = int_to_ptr.vmem [resolvable:$true] %s1189_s19 }
   0xd   :  { %1438 = vmatpush3.bf16.msra.mxu0 %v1437_v12  ;;  %v1723_v44 = vpack.c.bf16 %v20_v43, %v19_v42  ;;  %v22_v46 = vld [vmem:[%s1892_s1 + $0x38] sm:$0xff]  ;;  %v1199_v61 = vld [vmem:[%s1892_s1 + $0x60] ss:$0 sm:$0xff]  ;;  %vm221_vm8 = vmand %vm219_vm6, %vm220_vm7  ;;  %p1584_p1 = scmp.lt.s32.totalorder %s1190_s19, %s1190_s19 }
   0xe   :  { %1439 = vmatprep.subr.bf16.mxu0 %v1604_v4  ;;  %1456 = vmatpush3.bf16.msra.mxu1 %v1455_v39  ;;  %v1733_v47 = vpack.c.bf16 %v22_v46, %v21_v45  ;;  %v1760_v6 = vsel %vm221_vm8, 2.0, %v1607_v31  ;;  %v1763_v9 = vsel %vm221_vm8, -1.0, %v1606_v8 }
   0xf   :  { %1457 = vmatprep.subr.bf16.mxu1 %v1604_v4 }
  0x11   :  { %1441 = vmatpush3.bf16.msra.mxu0 %v1440_v15 }
  0x12   :  { %1442 = vmatprep.subr.bf16.mxu0 %v1604_v4  ;;  %1459 = vmatpush3.bf16.msra.mxu1 %v1458_v41 }
  0x13   :  { %1460 = vmatprep.subr.bf16.mxu1 %v1604_v4 }
  0x15   :  { %1444 = vmatpush3.bf16.msra.mxu0 %v1443_v18 }
  0x16   :  { %1445 = vmatprep.subr.bf16.mxu0 %v1604_v4 }
  0x19   :  { %1447 = vmatpush3.bf16.msra.mxu0 %v1446_v21 }
  0x1a   :  { %1448 = vmatprep.subr.bf16.mxu0 %v1604_v4 }
  0x1d   :  { %1450 = vmatpush3.bf16.msra.mxu0 %v1449_v24 }
  0x1e   :  { %1451 = vmatprep.subr.bf16.mxu0 %v1604_v4 }
  0x21   :  { %1453 = vmatpush3.bf16.msra.mxu0 %v1452_v27 }
  0x22   :  { %1478 = vmatprep.subr.bf16.mxu0 %v1604_v4 }
  0x81   :  { %v34_v30 = vpop.permute.xlu0 %33 }
  0x82   :  { %vm35_vm1 = vcmp.eq.s32.totalorder %v1696_v29, %v34_v30 }
  0x83   :  { %1318 = vmatmul.mubr.msk.f32.vlgmr.msra.gmra.mrb[0].mxu0 %vm35_vm1, %v1607_v31 }
  0x84   :  { %1372 = vmatprep.mubr.msk.f32.mxu0 %vm1605_vm0, %v1606_v8  ;;  %1480 = vmatpush3.bf16.msra.mxu0 %v1723_v44 }
  0x85   :  { %1481 = vmatprep.subr.bf16.mxu0 %v1604_v4 }
  0x88   :  { %1483 = vmatpush3.bf16.msra.mxu0 %v1733_v47 }
  0x89   :  { %1490 = vmatprep.subr.bf16.mxu0 %v1604_v4 }
 0x156   :  { %v120_v32 = vpop.f32.mrb[0].mxu0 }
 0x157   :  { %v124_v33 = vmul.f32 %v120_v32, %v120_v32  ;;  %v1319_v34 = vpop.f32.mrb[1].mxu0 }
 0x159   :  { %v126_v35 = vsel %vm125_vm2, %v124_v33, 0.0 }
 0x15a   :  { %127 = vadd.xlane.f32.xlu0 %v126_v35 }
 0x1e7   :  { %v128_v48 = vpop.xlane.xlu0 %127 }
 0x1e8   :  { %1523 = vrsqrt.f32 %v128_v48  ;;  %vm131_vm3 = vcmp.eq.f32.partialorder %v128_v48, inf  ;;  %v134_v51 = vand.u32 2147483648, %v128_v48  ;;  %vm133_vm4 = vcmp.eq.f32.partialorder %v128_v48, 0.0 }
 0x1f2   :  { %v1524_v49 = vpop.eup %1523 }
 0x1f3   :  { %v130_v50 = vmul.f32 %v1524_v49, %v128_v48 }
 0x1f5   :  { %v132_v52 = vsel %vm131_vm3, %v128_v48, %v130_v50 }
 0x1f6   :  { %v135_v53 = vsel %vm133_vm4, %v134_v51, %v132_v52 }
 0x1f7   :  { %v137_v54 = vadd.f32 1e-07, %v135_v53  ;;  %vm136_vm5 = vcmp.gt.f32.partialorder %v135_v53, 5.0 }
 0x1f9   :  { %1525 = vrcp.f32 %v137_v54 }
 0x203   :  { %v1526_v55 = vpop.eup %1525 }
 0x204   :  { %v139_v56 = vmul.f32 5.0, %v1526_v55 }
 0x206   :  { %v140_v57 = vsel %vm136_vm5, %v139_v56, 1.0 }
 0x207   :  { %v141_v58 = vmul.f32 %v140_v57, %v120_v32 }
 0x209   :  { %1329 = vmatmul.mubr.msk.f32.vlgmr.msra.gmra.mrb[0].mxu1 %vm125_vm2, %v141_v58 }
 0x20a   :  { %1462 = vmatpush3.bf16.msra.mxu1 %v1723_v44  ;;  %1339 = vmatprep.mubr.msk.f32.mxu1 %vm1605_vm0, %v1606_v8 }
 0x20b   :  { %1463 = vmatprep.subr.bf16.mxu1 %v1604_v4 }
 0x20e   :  { %1465 = vmatpush3.bf16.msra.mxu1 %v1733_v47 }
 0x20f   :  { %1466 = vmatprep.subr.bf16.mxu1 %v1604_v4 }
 0x211   :  { %1340 = vmatmul.mubr.f32.vlgmr.msra.gmra.mrb[2].mxu1 %v1606_v8 }
 0x212   :  { %1468 = vmatpush3.bf16.msra.mxu1 %v1723_v44  ;;  %1350 = vmatprep.mubr.msk.f32.mxu1 %vm1605_vm0, %v1606_v8 }
 0x213   :  { %1469 = vmatprep.subr.bf16.mxu1 %v1604_v4 }
 0x216   :  { %1471 = vmatpush3.bf16.msra.mxu1 %v1733_v47 }
 0x217   :  { %1472 = vmatprep.subr.bf16.mxu1 %v1604_v4 }
 0x2dc   :  { %v215_v59 = vpop.f32.mrb[0].mxu1 }
 0x2dd   :  { %v1330_v60 = vpop.f32.mrb[1].mxu1  ;;  %v1754_v62 = vadd.f32 %v1199_v61, %v215_v59 }
 0x2e4   :  { %v293_v63 = vpop.f32.mrb[2].mxu1 }
 0x2e5   :  { %v297_v0 = vadd.f32 %v293_v63, %v1754_v62  ;;  %v1341_v1 = vpop.f32.mrb[3].mxu1 }
 0x2e7   :  { %v1201_v2 = vmul.f32 -1.442695, %v297_v0 }
 0x2e9   :  { %1527 = vpow2.f32 %v1201_v2 }
 0x2f3   :  { %v1528_v3 = vpop.eup %1527 }
 0x2f4   :  { %v301_v5 = vadd.f32 1.0, %v1528_v3 }
 0x2f6   :  { %1529 = vrcp.f32 %v301_v5 }
 0x300   :  { %v1530_v7 = vpop.eup %1529 }
 0x301   :  { %v304_v10 = vmul.f32 %v1530_v7, %v1760_v6 }
 0x303   :  { %v305_v11 = vadd.f32 %v304_v10, %v1763_v9 }
 0x305   :  { %308 = vrot.lane.b32.xlu1 %v305_v11, %s1608_s7  ;;  %v306_v14 = vmul.f32 0.0, %v305_v11 }
 0x377   :  { %v309_v12 = vpop.permute.xlu1 %308 }
 0x378   :  { %v311_v13 = vmul.f32 %v309_v12, %v305_v11 }
 0x37a   :  { %313 = vrot.lane.b32.xlu1 %v311_v13, %s1609_s8 }
 0x3ec   :  { %v314_v15 = vpop.permute.xlu1 %313 }
 0x3ed   :  { %v316_v16 = vadd.f32 %v314_v15, %v306_v14 }
 0x3ef   :  { %1531 = vtanh.f32 %v316_v16  ;;  %v411_v33 = vrot.slane %v316_v16, 7 }
 0x3f9   :  { %v1532_v17 = vpop.eup %1531 }
 0x3fa   :  { %319 = vrot.lane.b32.xlu1 %v1532_v17, %s1608_s7 }
 0x46c   :  { %v320_v18 = vpop.permute.xlu1 %319 }
 0x46d   :  { %v1770_v19 = vmul.f32 %v320_v18, %v305_v11 }
 0x46f   :  { %324 = vrot.lane.b32.xlu1 %v1770_v19, %s1609_s8 }
 0x4e1   :  { %v325_v20 = vpop.permute.xlu1 %324 }
 0x4e2   :  { %1351 = vmatmul.mubr.msk.f32.vlgmr.msra.gmra.mrb[4].mxu1 %vm125_vm2, %v325_v20 }
 0x4e3   :  { %1474 = vmatpush3.bf16.msra.mxu1 %v1723_v44  ;;  %1361 = vmatprep.mubr.msk.f32.mxu1 %vm1605_vm0, %v1606_v8 }
 0x4e4   :  { %1475 = vmatprep.subr.bf16.mxu1 %v1604_v4 }
 0x4e7   :  { %1477 = vmatpush3.bf16.msra.mxu1 %v1733_v47 }
 0x4e8   :  { %1484 = vmatprep.subr.bf16.mxu1 %v1604_v4 }
 0x5b5   :  { %v394_v21 = vpop.f32.mrb[4].mxu1 }
 0x5b6   :  { %v399_v22 = vrot.slane %v394_v21, 7  ;;  %v1352_v23 = vpop.f32.mrb[5].mxu1 }
 0x5b8   :  { %v401_v24 = vadd.f32 %v399_v22, %v1754_v62 }
 0x5ba   :  { %v1203_v25 = vmul.f32 -1.442695, %v401_v24 }
 0x5bc   :  { %1533 = vpow2.f32 %v1203_v25 }
 0x5c6   :  { %v1534_v26 = vpop.eup %1533 }
 0x5c7   :  { %v405_v27 = vadd.f32 1.0, %v1534_v26 }
 0x5c9   :  { %1535 = vrcp.f32 %v405_v27 }
 0x5d3   :  { %v1536_v28 = vpop.eup %1535 }
 0x5d4   :  { %v408_v29 = vmul.f32 %v1536_v28, %v1760_v6 }
 0x5d6   :  { %v409_v30 = vadd.f32 %v408_v29, %v1763_v9 }
 0x5d8   :  { %415 = vrot.lane.b32.xlu1 %v409_v30, %s1608_s7  ;;  %v413_v34 = vmul.f32 %v411_v33, %v409_v30 }
 0x64a   :  { %v416_v31 = vpop.permute.xlu1 %415 }
 0x64b   :  { %v418_v32 = vmul.f32 %v416_v31, %v409_v30 }
 0x64d   :  { %420 = vrot.lane.b32.xlu1 %v418_v32, %s1609_s8 }
 0x6bf   :  { %v421_v35 = vpop.permute.xlu1 %420 }
 0x6c0   :  { %v423_v36 = vadd.f32 %v421_v35, %v413_v34 }
 0x6c2   :  { %1537 = vtanh.f32 %v423_v36  ;;  %v519_v56 = vrot.slane %v423_v36, 7 }
 0x6cc   :  { %v1538_v37 = vpop.eup %1537 }
 0x6cd   :  { %426 = vrot.lane.b32.xlu1 %v1538_v37, %s1608_s7 }
 0x73f   :  { %v427_v38 = vpop.permute.xlu1 %426 }
 0x740   :  { %v429_v39 = vmul.f32 %v427_v38, %v409_v30 }
 0x742   :  { %v431_v40 = vrot.slane %v429_v39, 1  ;;  %v1079_v0 = vsel %vm1078_vm9, %v1770_v19, %v429_v39 }
 0x744   :  { %432 = vrot.lane.b32.xlu1 %v431_v40, %s1609_s8 }
 0x7b6   :  { %v433_v41 = vpop.permute.xlu1 %432 }
 0x7b7   :  { %1362 = vmatmul.mubr.msk.f32.vlgmr.msra.gmra.mrb[6].mxu1 %vm125_vm2, %v433_v41 }
 0x7b8   :  { %1486 = vmatpush3.bf16.msra.mxu1 %v1723_v44  ;;  %1383 = vmatprep.mubr.msk.f32.mxu1 %vm1605_vm0, %v1606_v8 }
 0x7b9   :  { %1487 = vmatprep.subr.bf16.mxu1 %v1604_v4 }
 0x7bc   :  { %1489 = vmatpush3.bf16.msra.mxu1 %v1733_v47 }
 0x7bd   :  { %1496 = vmatprep.subr.bf16.mxu1 %v1604_v4 }
 0x88a   :  { %v502_v42 = vpop.f32.mrb[6].mxu1 }
 0x88b   :  { %v507_v43 = vrot.slane %v502_v42, 6  ;;  %v1363_v45 = vpop.f32.mrb[7].mxu1 }
 0x88d   :  { %v509_v46 = vadd.f32 %v507_v43, %v1754_v62 }
 0x88f   :  { %v1205_v48 = vmul.f32 -1.442695, %v509_v46 }
 0x891   :  { %1539 = vpow2.f32 %v1205_v48 }
 0x89b   :  { %v1540_v49 = vpop.eup %1539 }
 0x89c   :  { %v513_v50 = vadd.f32 1.0, %v1540_v49 }
 0x89e   :  { %1541 = vrcp.f32 %v513_v50 }
 0x8a8   :  { %v1542_v51 = vpop.eup %1541 }
 0x8a9   :  { %v516_v52 = vmul.f32 %v1542_v51, %v1760_v6 }
 0x8ab   :  { %v517_v53 = vadd.f32 %v516_v52, %v1763_v9 }
 0x8ad   :  { %523 = vrot.lane.b32.xlu1 %v517_v53, %s1608_s7  ;;  %v521_v57 = vmul.f32 %v519_v56, %v517_v53 }
 0x91f   :  { %v524_v54 = vpop.permute.xlu1 %523 }
 0x920   :  { %v526_v55 = vmul.f32 %v524_v54, %v517_v53 }
 0x922   :  { %528 = vrot.lane.b32.xlu0 %v526_v55, %s1609_s8 }
 0x994   :  { %v529_v58 = vpop.permute.xlu0 %528 }
 0x995   :  { %v531_v59 = vadd.f32 %v529_v58, %v521_v57 }
 0x997   :  { %1543 = vtanh.f32 %v531_v59  ;;  %v627_v20 = vrot.slane %v531_v59, 7 }
 0x9a1   :  { %v1544_v60 = vpop.eup %1543 }
 0x9a2   :  { %534 = vrot.lane.b32.xlu1 %v1544_v60, %s1608_s7 }
 0xa14   :  { %v535_v61 = vpop.permute.xlu1 %534 }
 0xa15   :  { %v537_v63 = vmul.f32 %v535_v61, %v517_v53 }
 0xa17   :  { %v539_v1 = vrot.slane %v537_v63, 2  ;;  %v1081_v2 = vsel %vm1080_vm10, %v1079_v0, %v537_v63 }
 0xa19   :  { %540 = vrot.lane.b32.xlu1 %v539_v1, %s1609_s8 }
 0xa8b   :  { %v541_v3 = vpop.permute.xlu1 %540 }
 0xa8c   :  { %1373 = vmatmul.mubr.msk.f32.vlgmr.msra.gmra.mrb[2].mxu0 %vm125_vm2, %v541_v3 }
 0xa8d   :  { %1492 = vmatpush3.bf16.msra.mxu0 %v1723_v44  ;;  %1394 = vmatprep.mubr.msk.f32.mxu0 %vm1605_vm0, %v1606_v8 }
 0xa8e   :  { %1493 = vmatprep.subr.bf16.mxu0 %v1604_v4 }
 0xa91   :  { %1495 = vmatpush3.bf16.msra.mxu0 %v1733_v47 }
 0xa92   :  { %1502 = vmatprep.subr.bf16.mxu0 %v1604_v4 }
 0xb5f   :  { %v610_v5 = vpop.f32.mrb[2].mxu0 }
 0xb60   :  { %v615_v7 = vrot.slane %v610_v5, 5  ;;  %v1374_v10 = vpop.f32.mrb[3].mxu0 }
 0xb62   :  { %v617_v11 = vadd.f32 %v615_v7, %v1754_v62 }
 0xb64   :  { %v1207_v12 = vmul.f32 -1.442695, %v617_v11 }
 0xb66   :  { %1545 = vpow2.f32 %v1207_v12 }
 0xb70   :  { %v1546_v13 = vpop.eup %1545 }
 0xb71   :  { %v621_v14 = vadd.f32 1.0, %v1546_v13 }
 0xb73   :  { %1547 = vrcp.f32 %v621_v14 }
 0xb7d   :  { %v1548_v15 = vpop.eup %1547 }
 0xb7e   :  { %v624_v16 = vmul.f32 %v1548_v15, %v1760_v6 }
 0xb80   :  { %v625_v17 = vadd.f32 %v624_v16, %v1763_v9 }
 0xb82   :  { %631 = vrot.lane.b32.xlu1 %v625_v17, %s1608_s7  ;;  %v629_v21 = vmul.f32 %v627_v20, %v625_v17 }
 0xbf4   :  { %v632_v18 = vpop.permute.xlu1 %631 }
 0xbf5   :  { %v634_v19 = vmul.f32 %v632_v18, %v625_v17 }
 0xbf7   :  { %636 = vrot.lane.b32.xlu1 %v634_v19, %s1609_s8 }
 0xc69   :  { %v637_v22 = vpop.permute.xlu1 %636 }
 0xc6a   :  { %v639_v23 = vadd.f32 %v637_v22, %v629_v21 }
 0xc6c   :  { %1549 = vtanh.f32 %v639_v23  ;;  %v735_v42 = vrot.slane %v639_v23, 7 }
 0xc76   :  { %v1550_v24 = vpop.eup %1549 }
 0xc77   :  { %642 = vrot.lane.b32.xlu1 %v1550_v24, %s1608_s7 }
 0xce9   :  { %v643_v25 = vpop.permute.xlu1 %642 }
 0xcea   :  { %v645_v26 = vmul.f32 %v643_v25, %v625_v17 }
 0xcec   :  { %v647_v27 = vrot.slane %v645_v26, 3  ;;  %v1083_v28 = vsel %vm1082_vm11, %v1081_v2, %v645_v26 }
 0xcee   :  { %648 = vrot.lane.b32.xlu1 %v647_v27, %s1609_s8 }
 0xd60   :  { %v649_v29 = vpop.permute.xlu1 %648 }
 0xd61   :  { %1384 = vmatmul.mubr.msk.f32.vlgmr.msra.gmra.mrb[8].mxu1 %vm125_vm2, %v649_v29 }
 0xd62   :  { %1498 = vmatpush3.bf16.msra.mxu1 %v1723_v44  ;;  %1405 = vmatprep.mubr.msk.f32.mxu1 %vm1605_vm0, %v1606_v8 }
 0xd63   :  { %1499 = vmatprep.subr.bf16.mxu1 %v1604_v4 }
 0xd66   :  { %1501 = vmatpush3.bf16.msra.mxu1 %v1733_v47 }
 0xd67   :  { %1508 = vmatprep.subr.bf16.mxu1 %v1604_v4 }
 0xe34   :  { %v718_v30 = vpop.f32.mrb[8].mxu1 }
 0xe35   :  { %v723_v31 = vrot.slane %v718_v30, 4  ;;  %v1385_v32 = vpop.f32.mrb[9].mxu1 }
 0xe37   :  { %v725_v33 = vadd.f32 %v723_v31, %v1754_v62 }
 0xe39   :  { %v1209_v34 = vmul.f32 -1.442695, %v725_v33 }
 0xe3b   :  { %1551 = vpow2.f32 %v1209_v34 }
 0xe45   :  { %v1552_v35 = vpop.eup %1551 }
 0xe46   :  { %v729_v36 = vadd.f32 1.0, %v1552_v35 }
 0xe48   :  { %1553 = vrcp.f32 %v729_v36 }
 0xe52   :  { %v1554_v37 = vpop.eup %1553 }
 0xe53   :  { %v732_v38 = vmul.f32 %v1554_v37, %v1760_v6 }
 0xe55   :  { %v733_v39 = vadd.f32 %v732_v38, %v1763_v9 }
 0xe57   :  { %739 = vrot.lane.b32.xlu0 %v733_v39, %s1608_s7  ;;  %v737_v43 = vmul.f32 %v735_v42, %v733_v39 }
 0xec9   :  { %v740_v40 = vpop.permute.xlu0 %739 }
 0xeca   :  { %v742_v41 = vmul.f32 %v740_v40, %v733_v39 }
 0xecc   :  { %744 = vrot.lane.b32.xlu1 %v742_v41, %s1609_s8 }
 0xf3e   :  { %v745_v45 = vpop.permute.xlu1 %744 }
 0xf3f   :  { %v747_v46 = vadd.f32 %v745_v45, %v737_v43 }
 0xf41   :  { %1555 = vtanh.f32 %v747_v46 }
 0xf4b   :  { %v1556_v48 = vpop.eup %1555 }
 0xf4c   :  { %750 = vrot.lane.b32.xlu0 %v1556_v48, %s1608_s7 }
 0xfbe   :  { %v751_v49 = vpop.permute.xlu0 %750 }
 0xfbf   :  { %v753_v50 = vmul.f32 %v751_v49, %v733_v39 }
 0xfc1   :  { %v755_v51 = vrot.slane %v753_v50, 4  ;;  %v1085_v52 = vsel %vm1084_vm12, %v1083_v28, %v753_v50 }
 0xfc3   :  { %756 = vrot.lane.b32.xlu1 %v755_v51, %s1609_s8 }
0x1035   :  { %v757_v53 = vpop.permute.xlu1 %756 }
0x1036   :  { %1395 = vmatmul.mubr.msk.f32.vlgmr.msra.gmra.mrb[4].mxu0 %vm125_vm2, %v757_v53  ;;  %v23_v53 = vld [vmem:[%s1892_s1 + $0x40] sm:$0xff] }
0x1037   :  { %1504 = vmatpush3.bf16.msra.mxu0 %v1723_v44  ;;  %1416 = vmatprep.mubr.msk.f32.mxu0 %vm1605_vm0, %v1606_v8 }
0x1038   :  { %1505 = vmatprep.subr.bf16.mxu0 %v1604_v4 }
0x103b   :  { %1507 = vmatpush3.bf16.msra.mxu0 %v1733_v47  ;;  %v843_v47 = vrot.slane %v747_v46, 7 }
0x1109   :  { %v826_v54 = vpop.f32.mrb[4].mxu0 }
0x110a   :  { %v831_v55 = vrot.slane %v826_v54, 3  ;;  %v1396_v56 = vpop.f32.mrb[5].mxu0 }
0x110c   :  { %v833_v57 = vadd.f32 %v831_v55, %v1754_v62  ;;  %v26_v55 = vld [vmem:[%s1892_s1 + $0x58] sm:$0xff] }
0x110e   :  { %v1211_v58 = vmul.f32 -1.442695, %v833_v57 }
0x1110   :  { %1557 = vpow2.f32 %v1211_v58 }
0x111a   :  { %v1558_v59 = vpop.eup %1557 }
0x111b   :  { %v837_v60 = vadd.f32 1.0, %v1558_v59 }
0x111d   :  { %1559 = vrcp.f32 %v837_v60 }
0x1127   :  { %v1560_v61 = vpop.eup %1559 }
0x1128   :  { %v840_v44 = vmul.f32 %v1560_v61, %v1760_v6 }
0x112a   :  { %v841_v63 = vadd.f32 %v840_v44, %v1763_v9  ;;  %v1216_v44 = vld [vmem:[%s1892_s1 + $0x68] ss:$0 sm:$0xff] }
0x112c   :  { %847 = vrot.lane.b32.xlu0 %v841_v63, %s1608_s7  ;;  %v845_v2 = vmul.f32 %v843_v47, %v841_v63 }
0x119e   :  { %v848_v0 = vpop.permute.xlu0 %847 }
0x119f   :  { %v850_v1 = vmul.f32 %v848_v0, %v841_v63 }
0x11a1   :  { %852 = vrot.lane.b32.xlu1 %v850_v1, %s1609_s8 }
0x1213   :  { %v853_v3 = vpop.permute.xlu1 %852 }
0x1214   :  { %v855_v5 = vadd.f32 %v853_v3, %v845_v2 }
0x1216   :  { %1561 = vtanh.f32 %v855_v5 }
0x1220   :  { %v1562_v7 = vpop.eup %1561 }
0x1221   :  { %858 = vrot.lane.b32.xlu0 %v1562_v7, %s1608_s7 }
0x1293   :  { %v859_v10 = vpop.permute.xlu0 %858 }
0x1294   :  { %v861_v11 = vmul.f32 %v859_v10, %v841_v63 }
0x1296   :  { %v863_v12 = vrot.slane %v861_v11, 5  ;;  %v1087_v13 = vsel %vm1086_vm13, %v1085_v52, %v861_v11 }
0x1298   :  { %864 = vrot.lane.b32.xlu1 %v863_v12, %s1609_s8 }
0x130a   :  { %v865_v14 = vpop.permute.xlu1 %864 }
0x130b   :  { %1406 = vmatmul.mubr.msk.f32.vlgmr.msra.gmra.mrb[10].mxu1 %vm125_vm2, %v865_v14 }
0x130c   :  { %1427 = vmatprep.mubr.msk.f32.mxu1 %vm1605_vm0, %v1606_v8  ;;  %v951_v8 = vrot.slane %v855_v5, 7 }
0x13de   :  { %v934_v15 = vpop.f32.mrb[10].mxu1 }
0x13df   :  { %v939_v16 = vrot.slane %v934_v15, 2  ;;  %v1407_v17 = vpop.f32.mrb[11].mxu1 }
0x13e1   :  { %v941_v18 = vadd.f32 %v939_v16, %v1754_v62 }
0x13e3   :  { %v1213_v19 = vmul.f32 -1.442695, %v941_v18 }
0x13e5   :  { %1563 = vpow2.f32 %v1213_v19 }
0x13ef   :  { %v1564_v20 = vpop.eup %1563 }
0x13f0   :  { %v945_v21 = vadd.f32 1.0, %v1564_v20 }
0x13f2   :  { %1565 = vrcp.f32 %v945_v21 }
0x13fc   :  { %v1566_v22 = vpop.eup %1565 }
0x13fd   :  { %v948_v23 = vmul.f32 %v1566_v22, %v1760_v6 }
0x13ff   :  { %v949_v24 = vadd.f32 %v948_v23, %v1763_v9 }
0x1401   :  { %955 = vrot.lane.b32.xlu0 %v949_v24, %s1608_s7  ;;  %v953_v27 = vmul.f32 %v951_v8, %v949_v24 }
0x1473   :  { %v956_v25 = vpop.permute.xlu0 %955 }
0x1474   :  { %v958_v26 = vmul.f32 %v956_v25, %v949_v24 }
0x1476   :  { %960 = vrot.lane.b32.xlu1 %v958_v26, %s1609_s8 }
0x14e8   :  { %v961_v28 = vpop.permute.xlu1 %960 }
0x14e9   :  { %v963_v29 = vadd.f32 %v961_v28, %v953_v27 }
0x14eb   :  { %1567 = vtanh.f32 %v963_v29  ;;  %v1059_v50 = vrot.slane %v963_v29, 7 }
0x14f5   :  { %v1568_v30 = vpop.eup %1567 }
0x14f6   :  { %966 = vrot.lane.b32.xlu0 %v1568_v30, %s1608_s7 }
0x1568   :  { %v967_v31 = vpop.permute.xlu0 %966 }
0x1569   :  { %v969_v32 = vmul.f32 %v967_v31, %v949_v24 }
0x156b   :  { %v971_v33 = vrot.slane %v969_v32, 6  ;;  %v1089_v34 = vsel %vm1088_vm14, %v1087_v13, %v969_v32 }
0x156d   :  { %972 = vrot.lane.b32.xlu1 %v971_v33, %s1609_s8 }
0x15df   :  { %v973_v35 = vpop.permute.xlu1 %972 }
0x15e0   :  { %1417 = vmatmul.mubr.msk.f32.vlgmr.msra.gmra.mrb[6].mxu0 %vm125_vm2, %v973_v35 }
0x16b3   :  { %v1042_v36 = vpop.f32.mrb[6].mxu0 }
0x16b4   :  { %v1047_v37 = vrot.slane %v1042_v36, 1  ;;  %v1418_v38 = vpop.f32.mrb[7].mxu0 }
0x16b6   :  { %v1049_v39 = vadd.f32 %v1047_v37, %v1754_v62 }
0x16b8   :  { %v1215_v40 = vmul.f32 -1.442695, %v1049_v39 }
0x16ba   :  { %1569 = vpow2.f32 %v1215_v40 }
0x16c4   :  { %v1570_v41 = vpop.eup %1569 }
0x16c5   :  { %v1053_v42 = vadd.f32 1.0, %v1570_v41 }
0x16c7   :  { %1571 = vrcp.f32 %v1053_v42 }
0x16d1   :  { %v1572_v43 = vpop.eup %1571 }
0x16d2   :  { %v1056_v45 = vmul.f32 %v1572_v43, %v1760_v6  ;;  %v24_v6 = vld [vmem:[%s1892_s1 + $0x48] sm:$0xff] }
0x16d3   :  { %v1509_v54 = vpack.c.bf16 %v24_v6, %v23_v53 }
0x16d4   :  { %v1057_v46 = vadd.f32 %v1056_v45, %v1763_v9  ;;  %v25_v9 = vld [vmem:[%s1892_s1 + $0x50] sm:$0xff]  ;;  %s1579_s1 = scalar_lea.vmem %s1190_s19, 128 }
0x16d5   :  { %1510 = vmatpush3.bf16.msra.mxu1 %v1509_v54  ;;  %v1512_v56 = vpack.c.bf16 %v26_v55, %v25_v9  ;;  %p1580_p0 = scmp.ne.s32.totalorder %s1190_s19, %s1579_s1  ;;  %p1585_p2 = scmp.lt.s32.totalorder %s1579_s1, %s1579_s1 }
0x16d6   :  { %1063 = vrot.lane.b32.xlu0 %v1057_v46, %s1608_s7  ;;  %v1061_v51 = vmul.f32 %v1059_v50, %v1057_v46  ;;  %1511 = vmatprep.subr.bf16.mxu1 %v1604_v4 }
0x16d7   :  { %p1586_p3 = por %p1585_p2, %p1584_p1 }
0x16d9   :  { %1513 = vmatpush3.bf16.msra.mxu1 %v1512_v56  ;;  %p1587_p4 = pnand %p1586_p3, %p1580_p0 }
0x1748   :  { %v1064_v48 = vpop.permute.xlu0 %1063 }
0x1749   :  { %v1066_v49 = vmul.f32 %v1064_v48, %v1057_v46 }
0x174b   :  { %1068 = vrot.lane.b32.xlu1 %v1066_v49, %s1609_s8 }
0x17bd   :  { %v1069_v52 = vpop.permute.xlu1 %1068 }
0x17be   :  { %v1071_v62 = vadd.f32 %v1069_v52, %v1061_v51 }
0x17c0   :  { %1573 = vtanh.f32 %v1071_v62 }
0x17ca   :  { %v1574_v57 = vpop.eup %1573 }
0x17cb   :  { %1074 = vrot.lane.b32.xlu0 %v1574_v57, %s1608_s7 }
0x183d   :  { %v1075_v58 = vpop.permute.xlu0 %1074 }
0x183e   :  { %v1077_v59 = vmul.f32 %v1075_v58, %v1057_v46 }
0x1840   :  { %v1091_v60 = vsel %vm1090_vm15, %v1089_v34, %v1077_v59 }
0x1841   :  { %1097 = vrot.lane.b32.xlu1 %v1091_v60, %s1609_s8 }
0x18b3   :  { %v1098_v61 = vpop.permute.xlu1 %1097 }
0x18b4   :  { %1428 = vmatmul.mubr.msk.f32.vlgmr.msra.gmra.mrb[12].mxu1 %vm125_vm2, %v1098_v61 }
0x1987   :  { %v1167_v63 = vpop.f32.mrb[12].mxu1 }
0x1988   :  { %v1168_v0 = vadd.f32 %v1216_v44, %v1167_v63  ;;  %v1429_v4 = vpop.f32.mrb[13].mxu1 }
0x198a   :  { %1171 = vmax.xlane.f32.xlu0 %v1168_v0 }
0x1a17   :  { %v1172_v1 = vpop.xlane.xlu0 %1171 }
0x1a18   :  { %v1173_v47 = vsub.f32 %v1168_v0, %v1172_v1 }
0x1a1a   :  { %v1174_v2 = vmul.f32 1.442695, %v1173_v47 }
0x1a1c   :  { %1575 = vpow2.f32 %v1174_v2 }
0x1a26   :  { %v1576_v3 = vpop.eup %1575 }
0x1a27   :  { %1176 = vadd.xlane.f32.xlu1 %v1576_v3 }
0x1ab4   :  { %v1177_v5 = vpop.xlane.xlu1 %1176 }
0x1ab5   :  { %1577 = vlog2.f32 %v1177_v5 }
0x1abf   :  { %v1578_v7 = vpop.eup %1577 }
0x1ac0   :  { %v1179_v10 = vmul.f32 0.6931472, %v1578_v7 }
0x1ac2   :  { %v1180_v11 = vadd.f32 %v1179_v10, %v1172_v1 }
0x1ac4   :  { %v1181_v12 = vsub.f32 %v1168_v0, %v1180_v11 }
0x1ac6   :  { %1182 = vst [vmem:[#allocation2] sm:$0xff] %v1181_v12 }
0x1ac7   :  { %1590 = shalt.err (!%p1587_p4)
}
0x1ac8   :  { %s1591_s21 = scalar_lea.hbm %s1894_s3, 128 }
0x1ac9   :  { %p1592_p5 = scmp.ne.s32.totalorder %s1894_s3, %s1591_s21  ;;  %p1595_p6 = scmp.lt.u32.totalorder %s1591_s21, %s1894_s3 }
0x1acb   :  { %p1597_p7 = pnand %p1595_p6, %p1592_p5 }
0x1acd   :  { %1600 = shalt.err (!%p1597_p7)
}
0x1ace   :  { %1192 = dma.vmem_to_hbm [thread:$0]  %s1190_s19, 128, %s1894_s3, [#allocation3]  }
0x1acf   :  { %1601 = dma.done.wait [#allocation3], 128  }
0x1ad0   :  { %1602 = vsyncadd [#allocation3], 4294967168 }
0x1ad1   :  { %1196 = vsyncpa [#allocation3], 1 }

</bundles_post_ra>
